<compile_context>
chip_gen: v7x
topology: tpu7x:2x2x1
jax: 0.10.0
libtpu: 0.0.40
codegen_flags: <defaults>
</compile_context>

<pallas_src>
import numpy as np

import jax
import jax.numpy as jnp
from jax.experimental import pallas as pl
from jax.experimental.pallas import tpu as pltpu


def _round_up(x, m):
    return ((x + m - 1) // m) * m


def _textcnn_kernel(x_ref, wconv_ref, add_ref, wlin_ref, blin_ref, o_ref):
    # x_ref:     (B_TILE, S*D)   flattened word embeddings
    # wconv_ref: (S*D, 3*S)      Toeplitz-packed conv weights (column = (gram, position))
    # add_ref:   (3, 3*S)        row g: conv-bias g on gram-g valid columns, -1e30 elsewhere
    # wlin_ref:  (3, LN_PAD)     transposed, zero-padded nn.Linear(3, label_num) weight
    # blin_ref:  (1, LN_PAD)     zero-padded linear bias
    # o_ref:     (B_TILE, LN_PAD)
    x = x_ref[...]
    # One MXU matmul computes every conv window for all three kernel sizes at once.
    # Default precision (single pass) keeps the kernel HBM-bound; error << test tolerance.
    conv = jnp.dot(x, wconv_ref[...], preferred_element_type=jnp.float32)   # (B_TILE, 3*S)

    feats = []
    for g in range(3):                              # kernel sizes 3, 4, 5
        # Masked max-pool over this gram's positions (other columns pushed to -1e30).
        m_g = jnp.max(conv + add_ref[g:g + 1, :], axis=1, keepdims=True)    # (B_TILE, 1)
        feats.append(jnp.maximum(m_g, 0.0))         # relu(max(conv)+b) == max(relu(conv+b))

    out = (feats[0] * wlin_ref[0:1, :]
           + feats[1] * wlin_ref[1:2, :]
           + feats[2] * wlin_ref[2:3, :]
           + blin_ref[...])                         # (B_TILE, LN_PAD)
    o_ref[...] = out.astype(o_ref.dtype)


def _build_packed_weights(w3, w4, w5, cbias, w_lin, b_lin, S, D, label_num):
    """Pack conv kernels into a (S*D, 3*S) Toeplitz matrix + per-gram bias/mask rows + padded
    linear. In a real model this is one-time parameter-init work."""
    NEG = -1e30
    LN_PAD = _round_up(max(label_num, 1), 128)

    cols, add_rows = [], []
    idx = (np.arange(S)[:, None] - np.arange(S)[None, :]) % S        # [s, i] -> (s - i) mod S
    for g, w in enumerate((w3, w4, w5)):
        k = w.shape[0]
        wpad = jnp.zeros((S, D), jnp.float32).at[:k, :].set(w.astype(jnp.float32))
        blk = wpad[idx]                                   # (S, S, D): [s, i, d] = wpad[(s-i)%S, d]
        blk = jnp.transpose(blk, (0, 2, 1)).reshape(S * D, S)        # column i = kernel at pos i
        valid_np = (np.arange(S) <= S - k)                           # position i valid iff i+k<=S
        blk = blk * jnp.asarray(valid_np, jnp.float32)[None, :]      # zero invalid columns
        cols.append(blk)

        row_g = jnp.where(jnp.asarray(valid_np), cbias[g].astype(jnp.float32), NEG)   # (S,)
        full_row = jnp.full((3 * S,), NEG, jnp.float32).at[g * S:(g + 1) * S].set(row_g)
        add_rows.append(full_row)

    wconv = jnp.concatenate(cols, axis=1)                            # (S*D, 3*S)
    add3 = jnp.stack(add_rows, axis=0)                               # (3, 3*S)

    wlin_t = jnp.zeros((3, LN_PAD), jnp.float32).at[:, :label_num].set(
        w_lin.T.astype(jnp.float32))
    blin = jnp.zeros((1, LN_PAD), jnp.float32).at[0, :label_num].set(
        b_lin.astype(jnp.float32))
    return wconv, add3, wlin_t, blin, LN_PAD


def _vmem_limit_bytes():
    """Generation-aware scoped-VMEM budget: ~3/4 of physical, capped at 64 MiB."""
    try:
        physical = int(pltpu.get_tpu_info().vmem_capacity_bytes)
    except Exception:
        physical = 64 * 1024 * 1024                                  # conservative (v7x-sized)
    return int(min(64 * 1024 * 1024, (physical * 3) // 4))


def textcnn_forward(x_nchw, params):
    """x_nchw: (B, 1, S, D) as in the PyTorch module. Returns (B, label_num)."""
    B, _, S, D = x_nchw.shape
    label_num = params["w_lin"].shape[0]

    wconv, add3, wlin_t, blin, LN_PAD = _build_packed_weights(
        params["w3"], params["w4"], params["w5"], params["cbias"],
        params["w_lin"], params["b_lin"], S, D, label_num)

    # Free contiguous reshape; keep x in its incoming dtype (no extra HBM cast pass).
    x2 = x_nchw.reshape(B, S * D)
    itemsize = x2.dtype.itemsize
    align = 16 if itemsize == 2 else 8                               # bf16 sublane packing

    # Batch-tile sizing: fit 2x double-buffered x tile + 2x output tile (+ ~2 MiB weights /
    # headroom) inside the generation-aware VMEM budget, capped at 4096 rows.
    vmem_limit = _vmem_limit_bytes()
    budget = max(vmem_limit - (2 << 20), 4 << 20)
    per_row_bytes = 2 * S * D * itemsize + 2 * LN_PAD * 4
    cap = budget // max(per_row_bytes, 1)
    cap = max(align, min(4096, (cap // align) * align))

    # Ensure >= 2 grid steps so both v7x TensorCores get work even for small batches.
    B_TILE = max(align, min(cap, _round_up(pl.cdiv(B, 2), align)))
    n_tiles = max(2, pl.cdiv(B, B_TILE))
    B_pad = n_tiles * B_TILE
    if B_pad != B:                                                   # padded rows sliced off below
        x2 = jnp.pad(x2, ((0, B_pad - B), (0, 0)))

    out = pl.pallas_call(
        _textcnn_kernel,
        out_shape=jax.ShapeDtypeStruct((B_pad, LN_PAD), jnp.float32),
        grid=(B_pad // B_TILE,),
        in_specs=[
            pl.BlockSpec((B_TILE, S * D), lambda b: (b, 0)),
            pl.BlockSpec((S * D, 3 * S), lambda b: (0, 0)),
            pl.BlockSpec((3, 3 * S), lambda b: (0, 0)),
            pl.BlockSpec((3, LN_PAD), lambda b: (0, 0)),
            pl.BlockSpec((1, LN_PAD), lambda b: (0, 0)),
        ],
        out_specs=pl.BlockSpec((B_TILE, LN_PAD), lambda b: (b, 0)),
        compiler_params=pltpu.CompilerParams(
            dimension_semantics=("parallel",),
            vmem_limit_bytes=vmem_limit,
        ),
    )(x2, wconv, add3, wlin_t, blin)

    return out[:B, :label_num]


def ref_forward(x_nchw, params):
    """Pure-JAX reference reproducing the PyTorch forward exactly."""
    x = x_nchw[:, 0].astype(jnp.float32)        # (B, S, D)
    B, S, _ = x.shape
    pooled = []
    for k, w, b in ((3, params["w3"], params["cbias"][0]),
                    (4, params["w4"], params["cbias"][1]),
                    (5, params["w5"], params["cbias"][2])):
        L = S - k + 1
        conv = jnp.stack(
            [jnp.einsum("bkd,kd->b", x[:, i:i + k, :], w) for i in range(L)],
            axis=1) + b                          # (B, L)
        pooled.append(jnp.max(jax.nn.relu(conv), axis=1))
    feat = jnp.stack(pooled, axis=-1)            # (B, 3) order: [conv3, conv4, conv5]
    return feat @ params["w_lin"].T + params["b_lin"]


def make_params(key, D, label_num):
    ks = jax.random.split(key, 6)
    u = lambda k, shape: jax.random.uniform(k, shape, jnp.float32, -0.1, 0.1)
    return {
        "w3": u(ks[0], (3, D)),                  # Conv2d(1,1,(3,D)).weight squeezed
        "w4": u(ks[1], (4, D)),
        "w5": u(ks[2], (5, D)),
        "cbias": u(ks[3], (3,)),                 # the three conv biases (out_ch=1 each)
        "w_lin": u(ks[4], (label_num, 3)),       # nn.Linear(3, label_num).weight
        "b_lin": u(ks[5], (label_num,)),
    }


if __name__ == "__main__":
    B, S, D, label_num = 2, 16, 32, 4            # sentence_max_size=16, word_emb_dim=32
    key = jax.random.PRNGKey(0)
    kx, kp = jax.random.split(key)
    x = jax.random.normal(kx, (B, 1, S, D), jnp.float32)   # NCHW like the PyTorch module
    params = make_params(kp, D, label_num)

    out = textcnn_forward(x, params)
    out = jax.block_until_ready(out)

    ref = ref_forward(x, params)
    assert out.shape == (B, label_num)
    assert jnp.allclose(out, ref, atol=5e-3, rtol=5e-3), (out, ref)
    print("KERNEL_OK")
</pallas_src>

<mosaic_0001>
module attributes {stable_mosaic.version = 11 : i64} {
  func.func @_textcnn_kernel(%arg0: i32, %arg1: memref<8x512xf32, #tpu.memory_space<vmem>>, %arg2: memref<512x48xf32, #tpu.memory_space<vmem>>, %arg3: memref<3x48xf32, #tpu.memory_space<vmem>>, %arg4: memref<3x128xf32, #tpu.memory_space<vmem>>, %arg5: memref<1x128xf32, #tpu.memory_space<vmem>>, %arg6: memref<8x128xf32, #tpu.memory_space<vmem>>) attributes {dimension_semantics = [#tpu.dimension_semantics<parallel>], iteration_bounds = array<i64: 2>, scalar_prefetch = 0 : i64, scratch_operands = 0 : i64, tpu.core_type = #tpu.core_type<tc>, window_params = [{transform_indices = @transform_0, window_bounds = array<i64: 8, 512>}, {pipeline_mode = #tpu.pipeline_mode<synchronous>, transform_indices = @transform_1, window_bounds = array<i64: 512, 48>}, {pipeline_mode = #tpu.pipeline_mode<synchronous>, transform_indices = @transform_2, window_bounds = array<i64: 3, 48>}, {pipeline_mode = #tpu.pipeline_mode<synchronous>, transform_indices = @transform_3, window_bounds = array<i64: 3, 128>}, {pipeline_mode = #tpu.pipeline_mode<synchronous>, transform_indices = @transform_4, window_bounds = array<i64: 1, 128>}, {transform_indices = @transform_5, window_bounds = array<i64: 8, 128>}]} {
    %c0 = arith.constant 0 : index
    %c0_0 = arith.constant 0 : index
    %0 = vector.load %arg1[%c0, %c0_0] : memref<8x512xf32, #tpu.memory_space<vmem>>, vector<8x512xf32>
    %c0_1 = arith.constant 0 : index
    %c0_2 = arith.constant 0 : index
    %1 = vector.load %arg2[%c0_1, %c0_2] : memref<512x48xf32, #tpu.memory_space<vmem>>, vector<512x48xf32>
    %cst = arith.constant dense<0.000000e+00> : vector<8x48xf32>
    %2 = tpu.matmul %0, %1, %cst {dimension_numbers = #tpu.dot_dimension_numbers<[1], [0], [0], [1], [0, 0, 1, 1], [], []>} : vector<8x512xf32>, vector<512x48xf32>, vector<8x48xf32> -> vector<8x48xf32>
    %c0_3 = arith.constant 0 : index
    %c0_4 = arith.constant 0 : index
    %3 = vector.load %arg3[%c0_3, %c0_4] : memref<3x48xf32, #tpu.memory_space<vmem>>, vector<1x48xf32>
    %4 = vector.broadcast %3 : vector<1x48xf32> to vector<8x48xf32>
    %5 = arith.addf %2, %4 : vector<8x48xf32>
    %cst_5 = arith.constant dense<0xFF800000> : vector<8xf32>
    %6 = vector.multi_reduction <maximumf>, %5, %cst_5 [1] : vector<8x48xf32> to vector<8xf32>
    %7 = vector.shape_cast %6 : vector<8xf32> to vector<8x1xf32>
    %cst_6 = arith.constant 0.000000e+00 : f32
    %8 = vector.broadcast %cst_6 : f32 to vector<8x1xf32>
    %9 = arith.maximumf %7, %8 : vector<8x1xf32>
    %c1 = arith.constant 1 : index
    %c0_7 = arith.constant 0 : index
    %10 = vector.load %arg3[%c1, %c0_7] : memref<3x48xf32, #tpu.memory_space<vmem>>, vector<1x48xf32>
    %11 = vector.broadcast %10 : vector<1x48xf32> to vector<8x48xf32>
    %12 = arith.addf %2, %11 : vector<8x48xf32>
    %cst_8 = arith.constant dense<0xFF800000> : vector<8xf32>
    %13 = vector.multi_reduction <maximumf>, %12, %cst_8 [1] : vector<8x48xf32> to vector<8xf32>
    %14 = vector.shape_cast %13 : vector<8xf32> to vector<8x1xf32>
    %cst_9 = arith.constant 0.000000e+00 : f32
    %15 = vector.broadcast %cst_9 : f32 to vector<8x1xf32>
    %16 = arith.maximumf %14, %15 : vector<8x1xf32>
    %c2 = arith.constant 2 : index
    %c0_10 = arith.constant 0 : index
    %17 = vector.load %arg3[%c2, %c0_10] : memref<3x48xf32, #tpu.memory_space<vmem>>, vector<1x48xf32>
    %18 = vector.broadcast %17 : vector<1x48xf32> to vector<8x48xf32>
    %19 = arith.addf %2, %18 : vector<8x48xf32>
    %cst_11 = arith.constant dense<0xFF800000> : vector<8xf32>
    %20 = vector.multi_reduction <maximumf>, %19, %cst_11 [1] : vector<8x48xf32> to vector<8xf32>
    %21 = vector.shape_cast %20 : vector<8xf32> to vector<8x1xf32>
    %cst_12 = arith.constant 0.000000e+00 : f32
    %22 = vector.broadcast %cst_12 : f32 to vector<8x1xf32>
    %23 = arith.maximumf %21, %22 : vector<8x1xf32>
    %c0_13 = arith.constant 0 : index
    %c0_14 = arith.constant 0 : index
    %24 = vector.load %arg4[%c0_13, %c0_14] : memref<3x128xf32, #tpu.memory_space<vmem>>, vector<1x128xf32>
    %25 = vector.broadcast %9 : vector<8x1xf32> to vector<8x128xf32>
    %26 = vector.broadcast %24 : vector<1x128xf32> to vector<8x128xf32>
    %27 = arith.mulf %25, %26 : vector<8x128xf32>
    %c1_15 = arith.constant 1 : index
    %c0_16 = arith.constant 0 : index
    %28 = vector.load %arg4[%c1_15, %c0_16] : memref<3x128xf32, #tpu.memory_space<vmem>>, vector<1x128xf32>
    %29 = vector.broadcast %16 : vector<8x1xf32> to vector<8x128xf32>
    %30 = vector.broadcast %28 : vector<1x128xf32> to vector<8x128xf32>
    %31 = arith.mulf %29, %30 : vector<8x128xf32>
    %32 = arith.addf %27, %31 : vector<8x128xf32>
    %c2_17 = arith.constant 2 : index
    %c0_18 = arith.constant 0 : index
    %33 = vector.load %arg4[%c2_17, %c0_18] : memref<3x128xf32, #tpu.memory_space<vmem>>, vector<1x128xf32>
    %34 = vector.broadcast %23 : vector<8x1xf32> to vector<8x128xf32>
    %35 = vector.broadcast %33 : vector<1x128xf32> to vector<8x128xf32>
    %36 = arith.mulf %34, %35 : vector<8x128xf32>
    %37 = arith.addf %32, %36 : vector<8x128xf32>
    %c0_19 = arith.constant 0 : index
    %c0_20 = arith.constant 0 : index
    %38 = vector.load %arg5[%c0_19, %c0_20] : memref<1x128xf32, #tpu.memory_space<vmem>>, vector<1x128xf32>
    %39 = vector.broadcast %38 : vector<1x128xf32> to vector<8x128xf32>
    %40 = arith.addf %37, %39 : vector<8x128xf32>
    %c0_21 = arith.constant 0 : index
    %c0_22 = arith.constant 0 : index
    %41 = vector.load %arg6[%c0_21, %c0_22] : memref<8x128xf32, #tpu.memory_space<vmem>>, vector<8x128xf32>
    tpu.vector_store %arg6[%c0_21, %c0_22], %40 {strides = array<i32>} : memref<8x128xf32, #tpu.memory_space<vmem>>, vector<8x128xf32>,
    return
  }
  func.func @transform_0(%arg0: i32) -> (i32, i32) {
    %c0_i32 = arith.constant 0 : i32
    %c0_i32_0 = arith.constant 0 : i32
    return %arg0, %c0_i32 : i32, i32
  }
  func.func @transform_1(%arg0: i32) -> (i32, i32) {
    %c0_i32 = arith.constant 0 : i32
    %c0_i32_0 = arith.constant 0 : i32
    %c0_i32_1 = arith.constant 0 : i32
    return %c0_i32, %c0_i32_0 : i32, i32
  }
  func.func @transform_2(%arg0: i32) -> (i32, i32) {
    %c0_i32 = arith.constant 0 : i32
    %c0_i32_0 = arith.constant 0 : i32
    %c0_i32_1 = arith.constant 0 : i32
    return %c0_i32, %c0_i32_0 : i32, i32
  }
  func.func @transform_3(%arg0: i32) -> (i32, i32) {
    %c0_i32 = arith.constant 0 : i32
    %c0_i32_0 = arith.constant 0 : i32
    %c0_i32_1 = arith.constant 0 : i32
    return %c0_i32, %c0_i32_0 : i32, i32
  }
  func.func @transform_4(%arg0: i32) -> (i32, i32) {
    %c0_i32 = arith.constant 0 : i32
    %c0_i32_0 = arith.constant 0 : i32
    %c0_i32_1 = arith.constant 0 : i32
    return %c0_i32, %c0_i32_0 : i32, i32
  }
  func.func @transform_5(%arg0: i32) -> (i32, i32) {
    %c0_i32 = arith.constant 0 : i32
    %c0_i32_0 = arith.constant 0 : i32
    return %arg0, %c0_i32 : i32, i32
  }
}

</mosaic_0001>

<bundles_post_ra>
// kernel: tpu_custom_call.1
= control target key start
LH: loop header
LB: loop body
LE: loop exit
PB: predicated region body
PF: predicated region fallthrough
CT: control target
= control target key end

     0   :  { %10 = vsyncpa [#allocation3], 0  ;;  %s1175_s0 = inlined_call_operand.vmem [shape: f32[16,512], index: 0, kind: input, shape index: {}]   ;;  %s1176_s1 = inlined_call_operand.vmem [shape: f32[512,48], index: 1, kind: input, shape index: {}]   ;;  %s1177_s2 = inlined_call_operand.vmem [shape: f32[3,48], index: 2, kind: input, shape index: {}]   ;;  %s1178_s3 = inlined_call_operand.vmem [shape: f32[3,128], index: 3, kind: input, shape index: {}]   ;;  %s1179_s4 = inlined_call_operand.vmem [shape: f32[1,128], index: 4, kind: input, shape index: {}]   ;;  %s1180_s5 = inlined_call_operand.hbm [shape: f32[16,128], index: 5, kind: output, shape index: {}]  }
   0x1   :  { %12 = vsyncpa [#allocation3 + $0x1], 0  ;;  %s851_s18 = smov 0   ;;  %s853_s19 = smov 0  }
   0x2   :  { %s855_s20 = smov 0   ;;  %s857_s21 = smov 0  }
   0x3 LB: > { %s872_s22 = sadd.s32 4294967295, %s818_s21   ;;  %s564_s23 = sadd.s32 4294967294, %s818_s21   ;;  %s818_s21 = sphi %s857_s21, %s1186_s21   ;;  %s814_s20 = sphi %s855_s20, %s1185_s20   ;;  %s810_s19 = sphi %s853_s19, %s1184_s19   ;;  %s806_s18 = sphi %s851_s18, %s1183_s18  }
   0x4   : > { %s876_s24 = sadd.s32 1, %s818_s21   ;;  %s135_s25 = sadd.s32 1, %s814_s20 }
   0x5   : > { %s132_s26 = ssub.s32 %s818_s21, %s876_s24  ;;  %p145_p0 = scmp.ne.s32.totalorder %s814_s20, %s810_s19 }
   0x6   : > { %p133_p1 = scmp.eq.s32.totalorder %s132_s26, 0  ;;  %p146_p2 = scmp.eq.s32.totalorder %s872_s22, 1 }
   0x7   : > { %p151_p3 = scmp.ne.s32.totalorder %s810_s19, %s806_s18  ;;  %p152_p4 = scmp.eq.s32.totalorder %s564_s23, 1 }
   0x8   : > { %s887_s27 = scalar_select %p133_p1, %s814_s20, %s135_s25  }
   0x9   : > { %p889_p5 = por %p146_p2, %p145_p0  ;;  %p893_p6 = por %p152_p4, %p151_p3 }
   0xa   : > { %p567_p7 = scmp.ge.s32.totalorder %s818_s21, 1  ;;  %p190_p8 = scmp.lt.s32.totalorder %s818_s21, 3 }
   0xc   : > { %p191_p9 = pnand %p567_p7, %p190_p8 }
   0xd   : > { %v243_v0 = vld [vmem:[%s1176_s1 + $0x80] sm:$0xff] (!%p191_p9)  ;;  %v244_v1 = vld [vmem:[%s1176_s1 + $0x88] sm:$0xff] (!%p191_p9)  ;;  %v245_v11 = vld [vmem:[%s1176_s1 + $0x90] sm:$0xff] (!%p191_p9)  ;;  %p218_p10 = scmp.lt.s32.totalorder (!%p191_p9), %s872_s22, 1  ;;  %vm437_vm0 = vcmask (!%p191_p9), 392192   ;;  %s215_s25 = sand.u32 (!%p191_p9), 1, %s810_s19  }
   0xe   : > { %194 = sbr.rel (%p191_p9) target bundleno = 440 (0x1b8), region = 40  ;;  %v275_v2 = vld [vmem:[%s1176_s1 + $0x180] sm:$0xff] (!%p191_p9)  ;;  %v653_v3 = vpack.c.bf16 (!%p191_p9), %v244_v1, %v243_v0  ;;  %v276_v4 = vld [vmem:[%s1176_s1 + $0x188] sm:$0xff] (!%p191_p9)  ;;  %v246_v13 = vld [vmem:[%s1176_s1 + $0x98] sm:$0xff] (!%p191_p9)  ;;  %s579_s11 = sshll.u32 (!%p191_p9), %s872_s22, 7 }
   0xf   : > { %v227_v5 = vld [vmem:[%s1176_s1] sm:$0xff] (!%p191_p9)  ;;  %v228_v6 = vld [vmem:[%s1176_s1 + $0x8] sm:$0xff] (!%p191_p9)  ;;  %v685_v7 = vpack.c.bf16 (!%p191_p9), %v276_v4, %v275_v2  ;;  %v277_v14 = vld [vmem:[%s1176_s1 + $0x190] sm:$0xff] (!%p191_p9)  ;;  %v657_v16 = vpack.c.bf16 (!%p191_p9), %v246_v13, %v245_v11  ;;  %s1133_s23 = scalar_lea.hbm (!%p191_p9), %s1180_s5, %s579_s11  ;;  %s492_s26 = scalar_lea.sflag (!%p191_p9), [#allocation3], %s215_s25 }
  0x10   : > { %v655_v8 = vpack.c.bf16 (!%p191_p9), %v228_v6, %v227_v5  ;;  %v259_v9 = vld [vmem:[%s1176_s1 + $0x100] sm:$0xff] (!%p191_p9)  ;;  %v260_v10 = vld [vmem:[%s1176_s1 + $0x108] sm:$0xff] (!%p191_p9)  ;;  %654 = vmatprep.subr.bf16.mxu0 (!%p191_p9), %v653_v3  ;;  %v278_v15 = vld [vmem:[%s1176_s1 + $0x198] sm:$0xff] (!%p191_p9) }
  0x11   : > { %v687_v12 = vpack.c.bf16 (!%p191_p9), %v260_v10, %v259_v9  ;;  %686 = vmatprep.subr.bf16.mxu1 (!%p191_p9), %v685_v7  ;;  %v689_v17 = vpack.c.bf16 (!%p191_p9), %v278_v15, %v277_v14  ;;  %v229_v18 = vld [vmem:[%s1176_s1 + $0x10] sm:$0xff] (!%p191_p9)  ;;  %v230_v19 = vld [vmem:[%s1176_s1 + $0x18] sm:$0xff] (!%p191_p9)  ;;  %v247_v23 = vld [vmem:[%s1176_s1 + $0xa0] sm:$0xff] (!%p191_p9) }
  0x12   : > { %656 = vmatpush3.bf16.msra.mxu0 (!%p191_p9), %v655_v8  ;;  %v261_v20 = vld [vmem:[%s1176_s1 + $0x110] sm:$0xff] (!%p191_p9)  ;;  %v659_v21 = vpack.c.bf16 (!%p191_p9), %v230_v19, %v229_v18  ;;  %v262_v22 = vld [vmem:[%s1176_s1 + $0x118] sm:$0xff] (!%p191_p9)  ;;  %v248_v24 = vld [vmem:[%s1176_s1 + $0xa8] sm:$0xff] (!%p191_p9) }
  0x13   : > { %688 = vmatpush3.bf16.msra.mxu1 (!%p191_p9), %v687_v12  ;;  %658 = vmatprep.subr.bf16.mxu0 (!%p191_p9), %v657_v16  ;;  %v691_v25 = vpack.c.bf16 (!%p191_p9), %v262_v22, %v261_v20  ;;  %v661_v26 = vpack.c.bf16 (!%p191_p9), %v248_v24, %v247_v23  ;;  %v279_v27 = vld [vmem:[%s1176_s1 + $0x1a0] sm:$0xff] (!%p191_p9)  ;;  %v280_v28 = vld [vmem:[%s1176_s1 + $0x1a8] sm:$0xff] (!%p191_p9)  ;;  %v249_v35 = vld [vmem:[%s1176_s1 + $0xb0] sm:$0xff] (!%p191_p9) }
  0x14   : > { %690 = vmatprep.subr.bf16.mxu1 (!%p191_p9), %v689_v17  ;;  %v231_v29 = vld [vmem:[%s1176_s1 + $0x20] sm:$0xff] (!%p191_p9)  ;;  %v693_v30 = vpack.c.bf16 (!%p191_p9), %v280_v28, %v279_v27  ;;  %v232_v31 = vld [vmem:[%s1176_s1 + $0x28] sm:$0xff] (!%p191_p9)  ;;  %v250_v36 = vld [vmem:[%s1176_s1 + $0xb8] sm:$0xff] (!%p191_p9) }
  0x15   : > { %v263_v32 = vld [vmem:[%s1176_s1 + $0x120] sm:$0xff]  ;;  %v264_v33 = vld [vmem:[%s1176_s1 + $0x128] sm:$0xff]  ;;  %v663_v34 = vpack.c.bf16 %v232_v31, %v231_v29  ;;  %v281_v37 = vld [vmem:[%s1176_s1 + $0x1b0] sm:$0xff]  ;;  %v665_v39 = vpack.c.bf16 %v250_v36, %v249_v35  ;;  %s1011_s13 = scalar_select %p218_p10, %s872_s22, 1 }
  0x16   : > { %660 = vmatpush3.bf16.msra.mxu0 %v659_v21  ;;  %v695_v38 = vpack.c.bf16 %v264_v33, %v263_v32  ;;  %v282_v40 = vld [vmem:[%s1176_s1 + $0x1b8] sm:$0xff]  ;;  %v233_v41 = vld [vmem:[%s1176_s1 + $0x30] sm:$0xff]  ;;  %v251_v46 = vld [vmem:[%s1176_s1 + $0xc0] sm:$0xff]  ;;  %s820_s22 = smov [#allocation2]  }
  0x17   : > { %692 = vmatpush3.bf16.msra.mxu1 %v691_v25  ;;  %662 = vmatprep.subr.bf16.mxu0 %v661_v26  ;;  %v234_v42 = vld [vmem:[%s1176_s1 + $0x38] sm:$0xff]  ;;  %v697_v43 = vpack.c.bf16 %v282_v40, %v281_v37  ;;  %v265_v44 = vld [vmem:[%s1176_s1 + $0x130] sm:$0xff]  ;;  %v252_v47 = vld [vmem:[%s1176_s1 + $0xc8] sm:$0xff]  ;;  %s582_s15 = sshll.u32 %s1011_s13, 5  ;;  %s760_s13 = sshll.u32 %s820_s22, 4  ;;  %s761_s13 = int_to_ptr.vmem [resolvable:$false] %s760_s13 }
  0x18   : > { %694 = vmatprep.subr.bf16.mxu1 %v693_v30  ;;  %v266_v45 = vld [vmem:[%s1176_s1 + $0x138] sm:$0xff]  ;;  %v283_v48 = vld [vmem:[%s1176_s1 + $0x1c0] sm:$0xff]  ;;  %v284_v49 = vld [vmem:[%s1176_s1 + $0x1c8] sm:$0xff]  ;;  %v667_v50 = vpack.c.bf16 %v234_v42, %v233_v41  ;;  %v669_v52 = vpack.c.bf16 %v252_v47, %v251_v46  ;;  %s1059_s14 = scalar_lea.vmem %s1175_s0, %s582_s15  ;;  %s568_s15 = sshll.u32 %s215_s25, 3 }
  0x19   : > { %v699_v51 = vpack.c.bf16 %v266_v45, %v265_v44  ;;  %v235_v53 = vld [vmem:[%s1176_s1 + $0x40] sm:$0xff]  ;;  %v236_v54 = vld [vmem:[%s1176_s1 + $0x48] sm:$0xff]  ;;  %v701_v56 = vpack.c.bf16 %v284_v49, %v283_v48  ;;  %v253_v58 = vld [vmem:[%s1176_s1 + $0xd0] sm:$0xff]  ;;  %s217_s12 = scalar_lea.vmem [#allocation2], %s568_s15  ;;  %s762_s6 = scalar_lea.vmem %s761_s13, 256 }
  0x1a   : > { %664 = vmatpush3.bf16.msra.mxu0 %v663_v34  ;;  %v267_v55 = vld [vmem:[%s1176_s1 + $0x140] sm:$0xff]  ;;  %v268_v57 = vld [vmem:[%s1176_s1 + $0x148] sm:$0xff]  ;;  %v254_v59 = vld [vmem:[%s1176_s1 + $0xd8] sm:$0xff]  ;;  %v671_v62 = vpack.c.bf16 %v236_v54, %v235_v53  ;;  %s505_s16 = sshll.u32 %s217_s12, 4  ;;  %s1135_s16 = int_to_ptr.vmem [resolvable:$true] %s505_s16 }
  0x1b   : > { %696 = vmatpush3.bf16.msra.mxu1 %v695_v38  ;;  %666 = vmatprep.subr.bf16.mxu0 %v665_v39  ;;  %v285_v60 = vld [vmem:[%s1176_s1 + $0x1d0] sm:$0xff]  ;;  %v286_v61 = vld [vmem:[%s1176_s1 + $0x1d8] sm:$0xff]  ;;  %v703_v63 = vpack.c.bf16 %v268_v57, %v267_v55  ;;  %v673_v0 = vpack.c.bf16 %v254_v59, %v253_v58  ;;  %v255_v6 = vld [vmem:[%s1176_s1 + $0xe0] sm:$0xff]  ;;  %s756_s30 = scalar_lea.vmem %s1135_s16, 128  ;;  %p763_p0 = scmp.lt.s32.totalorder %s1135_s16, %s761_s13 }
  0x1c   : > { %698 = vmatprep.subr.bf16.mxu1 %v697_v43  ;;  %v237_v1 = vld [vmem:[%s1176_s1 + $0x50] sm:$0xff]  ;;  %v238_v2 = vld [vmem:[%s1176_s1 + $0x58] sm:$0xff]  ;;  %v705_v4 = vpack.c.bf16 %v286_v61, %v285_v60  ;;  %v256_v7 = vld [vmem:[%s1176_s1 + $0xe8] sm:$0xff]  ;;  %p757_p11 = scmp.ne.s32.totalorder %s1135_s16, %s756_s30  ;;  %p764_p1 = scmp.lt.s32.totalorder %s762_s6, %s756_s30 }
  0x1d   : > { %v269_v3 = vld [vmem:[%s1176_s1 + $0x150] sm:$0xff]  ;;  %v270_v5 = vld [vmem:[%s1176_s1 + $0x158] sm:$0xff]  ;;  %v287_v8 = vld [vmem:[%s1176_s1 + $0x1e0] sm:$0xff]  ;;  %v675_v10 = vpack.c.bf16 %v238_v2, %v237_v1  ;;  %v677_v14 = vpack.c.bf16 %v256_v7, %v255_v6 }
  0x1e   : > { %668 = vmatpush3.bf16.msra.mxu0 %v667_v50  ;;  %v288_v9 = vld [vmem:[%s1176_s1 + $0x1e8] sm:$0xff]  ;;  %v239_v11 = vld [vmem:[%s1176_s1 + $0x60] sm:$0xff]  ;;  %v707_v13 = vpack.c.bf16 %v270_v5, %v269_v3  ;;  %v226_v17 = vld [vmem:[%s1059_s14 + $0x18] sm:$0xff]  ;;  %p758_p12 = pnand %p757_p11, %p889_p5  ;;  %p765_p2 = por %p764_p1, %p763_p0 }
  0x1f   : > { %700 = vmatpush3.bf16.msra.mxu1 %v699_v51  ;;  %670 = vmatprep.subr.bf16.mxu0 %v669_v52  ;;  %v240_v12 = vld [vmem:[%s1176_s1 + $0x68] sm:$0xff]  ;;  %v271_v15 = vld [vmem:[%s1176_s1 + $0x160] sm:$0xff]  ;;  %v709_v18 = vpack.c.bf16 %v288_v9, %v287_v8  ;;  %v257_v20 = vld [vmem:[%s1176_s1 + $0xf0] sm:$0xff] }
  0x20   : > { %702 = vmatprep.subr.bf16.mxu1 %v701_v56  ;;  %v224_v16 = vld [vmem:[%s1059_s14 + $0x8] sm:$0xff]  ;;  %v258_v21 = vld [vmem:[%s1176_s1 + $0xf8] sm:$0xff]  ;;  %v289_v22 = vld [vmem:[%s1176_s1 + $0x1f0] sm:$0xff]  ;;  %425 = vmatprep.mubr.f32.mxu1 %v226_v17  ;;  %v679_v24 = vpack.c.bf16 %v240_v12, %v239_v11  ;;  %p759_p13 = pneg %p758_p12 }
  0x21   : > { %v272_v19 = vld [vmem:[%s1176_s1 + $0x168] sm:$0xff]  ;;  %355 = vmatprep.mubr.f32.mxu0 %v224_v16  ;;  %v290_v23 = vld [vmem:[%s1176_s1 + $0x1f8] sm:$0xff]  ;;  %v681_v26 = vpack.c.bf16 %v258_v21, %v257_v20  ;;  %v241_v27 = vld [vmem:[%s1176_s1 + $0x70] sm:$0xff] }
  0x22   : > { %672 = vmatpush3.bf16.msra.mxu0 %v671_v62  ;;  %v711_v25 = vpack.c.bf16 %v272_v19, %v271_v15  ;;  %v242_v28 = vld [vmem:[%s1176_s1 + $0x78] sm:$0xff]  ;;  %v713_v29 = vpack.c.bf16 %v290_v23, %v289_v22  ;;  %v273_v30 = vld [vmem:[%s1176_s1 + $0x170] sm:$0xff]  ;;  %v223_v34 = vld [vmem:[%s1059_s14] sm:$0xff]  ;;  %p766_p3 = pnand %p765_p2, %p759_p13 }
  0x23   : > { %704 = vmatpush3.bf16.msra.mxu1 %v703_v63  ;;  %674 = vmatprep.subr.bf16.mxu0 %v673_v0  ;;  %v274_v31 = vld [vmem:[%s1176_s1 + $0x178] sm:$0xff]  ;;  %v683_v32 = vpack.c.bf16 %v242_v28, %v241_v27  ;;  %v225_v35 = vld [vmem:[%s1059_s14 + $0x10] sm:$0xff]  ;;  %v573_v42 = vld [vmem:[%s1177_s2 + $0x2] ss:$0 sm:$0xff] }
  0x24   : > { %706 = vmatprep.subr.bf16.mxu1 %v705_v4  ;;  %v715_v33 = vpack.c.bf16 %v274_v31, %v273_v30  ;;  %v571_v43 = vld [vmem:[%s1177_s2] ss:$0 sm:$0xff]  ;;  %v572_v45 = vld [vmem:[%s1177_s2 + $0x1] ss:$0 sm:$0xff]  ;;  %v576_v60 = vld [vmem:[%s1178_s3 + $0x2] ss:$0 sm:$0xff] }
  0x25   : > { %v574_v55 = vld [vmem:[%s1178_s3] ss:$0 sm:$0xff]  ;;  %v575_v56 = vld [vmem:[%s1178_s3 + $0x1] ss:$0 sm:$0xff] }
  0x26   : > { %676 = vmatpush3.bf16.msra.mxu0 %v675_v10  ;;  %v577_v1 = vld [vmem:[%s1179_s4] ss:$0 sm:$0xff] }
  0x27   : > { %708 = vmatpush3.bf16.msra.mxu1 %v707_v13  ;;  %678 = vmatprep.subr.bf16.mxu0 %v677_v14 }
  0x28   : > { %710 = vmatprep.subr.bf16.mxu1 %v709_v18 }
  0x2a   : > { %680 = vmatpush3.bf16.msra.mxu0 %v679_v24 }
  0x2b   : > { %712 = vmatpush3.bf16.msra.mxu1 %v711_v25  ;;  %682 = vmatprep.subr.bf16.mxu0 %v681_v26 }
  0x2c   : > { %714 = vmatprep.subr.bf16.mxu1 %v713_v29 }
  0x2e   : > { %684 = vmatpush3.bf16.msra.mxu0 %v683_v32 }
  0x2f   : > { %716 = vmatpush3.bf16.msra.mxu1 %v715_v33 }
  0x31   : > { %356 = vmatmul.mubr.f32.vlgmr.msra.gmra.mrb[0].mxu0 %v223_v34 }
  0x32   : > { %426 = vmatmul.mubr.f32.vlgmr.msra.gmra.mrb[0].mxu1 %v225_v35 }
 0x104   : > { %v615_v36 = vpop.f32.mrb[0].mxu0 }
 0x105   : > { %v650_v37 = vpop.f32.mrb[0].mxu1  ;;  %v616_v38 = vpop.f32.mrb[1].mxu0 }
 0x106   : > { %v617_v39 = vadd.f32 %v616_v38, %v615_v36  ;;  %v651_v40 = vpop.f32.mrb[1].mxu1 }
 0x107   : > { %v652_v41 = vadd.f32 %v651_v40, %v650_v37 }
 0x109   : > { %v428_v44 = vadd.f32 %v652_v41, %v617_v39 }
 0x10b   : > { %v457_v46 = vadd.f32 %v573_v42, %v428_v44  ;;  %v436_v47 = vadd.f32 %v571_v43, %v428_v44  ;;  %v447_v50 = vadd.f32 %v572_v45, %v428_v44 }
 0x10d   : > { %v458_v48 = vsel %vm437_vm0, %v457_v46, -inf  ;;  %v438_v49 = vsel %vm437_vm0, %v436_v47, -inf  ;;  %v448_v51 = vsel %vm437_vm0, %v447_v50, -inf }
 0x10e   : > { %459 = vmax.xlane.f32.xlu1 %v458_v48  ;;  %439 = vmax.xlane.f32.xlu0 %v438_v49 }
 0x112   : > { %449 = vmax.xlane.f32.xlu0 %v448_v51 }
 0x19b   : > { %v440_v52 = vpop.xlane.xlu0 %439  ;;  %v460_v53 = vpop.xlane.xlu1 %459 }
 0x19c   : > { %v441_v54 = vmax.f32 %v440_v52, 0.0  ;;  %v461_v58 = vmax.f32 %v460_v53, 0.0 }
 0x19e   : > { %v467_v61 = vmul.f32 %v574_v55, %v441_v54  ;;  %v480_v63 = vmul.f32 %v576_v60, %v461_v58 }
 0x19f   : > { %v450_v57 = vpop.xlane.xlu0 %449 }
 0x1a0   : > { %v451_v59 = vmax.f32 %v450_v57, 0.0 }
 0x1a2   : > { %v473_v62 = vmul.f32 %v575_v56, %v451_v59 }
 0x1a4   : > { %v474_v0 = vadd.f32 %v473_v62, %v467_v61 }
 0x1a6   : > { %v481_v2 = vadd.f32 %v480_v63, %v474_v0 }
 0x1a8   : > { %v489_v3 = vadd.f32 %v577_v1, %v481_v2 }
 0x1aa   : > { %490 = vst [vmem:[%s217_s12] sm:$0xff] %v489_v3 }
 0x1ab   : > { %769 = shalt.err (!%p766_p3)
}
 0x1ac   : > { %s770_s25 = scalar_lea.hbm %s1133_s23, 128  ;;  %s774_s8 = scalar_lea.hbm %s1180_s5, 256 }
 0x1ad   : > { %p771_p4 = scmp.ne.s32.totalorder %s1133_s23, %s770_s25  ;;  %p775_p9 = scmp.lt.u32.totalorder %s1133_s23, %s1180_s5 }
 0x1ae   : > { %p776_p10 = scmp.lt.u32.totalorder %s774_s8, %s770_s25  ;;  %p778_p12 = scmp.lt.u32.totalorder %s770_s25, %s1133_s23 }
 0x1af   : > { %p772_p7 = pnand %p771_p4, %p889_p5 }
 0x1b0   : > { %p777_p11 = por %p776_p10, %p775_p9 }
 0x1b1   : > { %p773_p8 = pneg %p772_p7 }
 0x1b2   : > { %p779_p13 = por %p778_p12, %p777_p11 }
 0x1b4   : > { %p780_p0 = pnand %p779_p13, %p773_p8 }
 0x1b6   : > { %783 = shalt.err (!%p780_p0)
}
 0x1b7   : > { %717 = dma.vmem_to_hbm [thread:$0]  (%p889_p5), %s1135_s16, 128, %s1133_s23, %s492_s26  }
 0x1b8 PF: > { %p723_p1 = scmp.ge.s32.totalorder %s818_s21, 2  ;;  %s517_s11 = sand.u32 1, %s806_s18  }
 0x1b9   : > { %s518_s12 = scalar_lea.sflag [#allocation3], %s517_s11 }
 0x1ba   : > { %p720_p2 = pnand %p723_p1, %p893_p6 }
 0x1bc   : > { %801 = dma.done.wait (!%p720_p2), %s518_s12, 128  }
 0x1bd   : > { %803 = vsyncadd (!%p720_p2), %s518_s12, 4294967168  ;;  %p15_p3 = scmp.ge.s32.totalorder %s876_s24, 4   ;;  %s1183_s18 = smov %s810_s19 }
 0x1be   : > { %s1184_s19 = smov %s814_s20  ;;  %s1185_s20 = smov %s887_s27 }
 0x1bf   : > { %s1186_s21 = smov %s876_s24  ;;  %17 = sbr.rel (!%p15_p3) target bundleno = 3 (0x3), region = 75 }
 0x1c6   :  { %523 = vsyncpa [#allocation3], 1 }
 0x1c7   :  { %525 = vsyncpa [#allocation3 + $0x1], 1 }

</bundles_post_ra>
